<compile_context>
chip_gen: v7x
topology: tpu7x:2x2x1
jax: 0.10.0
libtpu: 0.0.40
codegen_flags: <defaults>
</compile_context>

<pallas_src>
import functools

import jax
import jax.numpy as jnp
from jax.experimental import pallas as pl
from jax.experimental.pallas import tpu as pltpu


def _round_up(v, m):
    return (v + m - 1) // m * m


def _pick_hw_tile(hw, batch):
    """Lane-dense HW tile; big enough to amortize per-step overhead, small
    enough to keep >=2 grid programs on a parallel axis when batch == 1."""
    t = 512 if hw >= 512 else max(128, _round_up(hw, 128))
    while batch == 1 and t > 128 and pl.cdiv(hw, t) < 2:
        t = _round_up(max(t // 2, 128), 128)
    return t


def _yolo_head_kernel(wh_rows, x_ref, gxgy_ref, w_ref, wwh_ref, c_ref, cw_ref,
                      o_ref):
    """Per-tile fused 1x1 conv + decode.

    x_ref:    (Cin, T) f32        activations (cast to MXU dtype in-kernel)
    gxgy_ref: (2, T)   f32        row 0 = grid x, row 1 = grid y
    w_ref:    (CP, Cin) bf16      all channels' conv weights (original order)
    wwh_ref:  (CWp, Cin) f32      w/h channels' weights (f32 path)
    c_ref:    (CP, 4)  f32        [bias, c_sig, c_gx, c_gy] per output row
    cw_ref:   (CWp, 2) f32        [bias, anchor] per w/h row
    o_ref:    (CP, T)             decoded output (original channel order)
    wh_rows:  static tuple of output rows taken from the f32 exp path.
    """
    x = x_ref[...]                                           # (Cin, T) f32
    gx = gxgy_ref[0:1, :]                                    # (1, T)
    gy = gxgy_ref[1:2, :]

    # 1x1 conv == channel matmul on the MXU; bf16 inputs, f32 accumulate.
    y = jnp.dot(w_ref[...], x.astype(w_ref.dtype),
                preferred_element_type=jnp.float32)          # (CP, T)
    c = c_ref[...]                                           # (CP, 4)
    y = y + c[:, 0:1]

    # Sigmoid / grid-offset decode (constants are zero on w/h + padded rows).
    out = (jax.nn.sigmoid(y) * c[:, 1:2]
           + gx * c[:, 2:3]
           + gy * c[:, 3:4])
    o_ref[...] = out.astype(o_ref.dtype)

    # w/h rows: tiny f32 matmul + exp so bf16 rounding is not amplified.
    cw = cw_ref[...]                                         # (CWp, 2)
    ywh = jnp.dot(wwh_ref[...], x, preferred_element_type=jnp.float32)
    bwh = jnp.exp(ywh + cw[:, 0:1]) * cw[:, 1:2]             # (CWp, T)
    for i, r in enumerate(wh_rows):                          # static unroll
        o_ref[r:r + 1, :] = bwh[i:i + 1, :].astype(o_ref.dtype)


def yolo_head_forward(x_nchw, weight, bias, anchors, scale, *,
                      hw_tile=None, matmul_dtype=jnp.bfloat16,
                      out_dtype=jnp.float32):
    """x_nchw: (B, Cin, H, W) f32. weight: (Cout, Cin, 1, 1). bias: (Cout,).
    anchors: (A, 2). Returns (B, A, H, W, 5 + num_classes)."""
    B, Cin, H, W = x_nchw.shape
    Cout = weight.shape[0]
    A = anchors.shape[0]
    D = Cout // A
    HW = H * W
    f32 = jnp.float32

    T = hw_tile if hw_tile is not None else _pick_hw_tile(HW, B)
    assert T % 128 == 0, T
    n_hw = pl.cdiv(HW, T)

    CP = _round_up(Cout, 8)                    # padded output rows
    wh_rows = tuple(a * D + k for a in range(A) for k in (2, 3))
    CWp = _round_up(len(wh_rows), 8)

    # ---- weights + fused decode constants (original channel order).
    w2d = weight.reshape(Cout, Cin).astype(f32)
    w_all = jnp.zeros((CP, Cin), f32).at[:Cout].set(w2d).astype(matmul_dtype)

    scale = float(scale)
    k_idx = jnp.arange(CP, dtype=jnp.int32) % D
    valid = jnp.arange(CP) < Cout
    is_xy = valid & ((k_idx == 0) | (k_idx == 1))
    is_wh = valid & ((k_idx == 2) | (k_idx == 3))
    b_col = jnp.zeros((CP,), f32).at[:Cout].set(bias.astype(f32))
    c_sig = jnp.where(is_wh | ~valid, 0.0,
                      jnp.where(is_xy, scale, 1.0)).astype(f32)
    c_gx = jnp.where(valid & (k_idx == 0), scale, 0.0).astype(f32)
    c_gy = jnp.where(valid & (k_idx == 1), scale, 0.0).astype(f32)
    consts = jnp.stack([b_col, c_sig, c_gx, c_gy], axis=1)            # (CP, 4)

    anchors = jnp.asarray(anchors, f32)
    wh_idx = jnp.array(wh_rows, jnp.int32)
    w_wh = jnp.zeros((CWp, Cin), f32).at[:len(wh_rows)].set(w2d[wh_idx])
    b_wh = jnp.zeros((CWp,), f32).at[:len(wh_rows)].set(
        bias.astype(f32)[wh_idx])
    anc = jnp.zeros((CWp,), f32).at[:len(wh_rows)].set(
        anchors[jnp.array([r // D for r in wh_rows], jnp.int32),
                jnp.array([r % D - 2 for r in wh_rows], jnp.int32)])
    consts_wh = jnp.stack([b_wh, anc], axis=1)                        # (CWp, 2)

    # Grid-cell coordinates as a tiny f32 side input (no int div/mod in-kernel)
    pos = jnp.arange(HW, dtype=jnp.int32)
    gxgy = jnp.stack([(pos % W).astype(f32), (pos // W).astype(f32)])  # (2, HW)

    # NCHW consumed directly (free reshape); x stays f32 in HBM.
    x_r = x_nchw.reshape(B, Cin, HW)

    # ---- generation-aware VMEM budget.
    out_isz = jnp.dtype(out_dtype).itemsize
    mm_isz = jnp.dtype(matmul_dtype).itemsize
    est = (2 * Cin * T * 4                          # x tiles (double-buffered)
           + 2 * 2 * T * 4                          # gx/gy tiles
           + 2 * CP * T * out_isz                   # output tiles
           + 2 * CP * max(Cin, 128) * mm_isz        # weights
           + 2 * CWp * max(Cin, 128) * 4
           + 2 * (CP + CWp) * 128 * 4               # packed constants
           + 5 * CP * T * 4)                        # in-kernel f32 temporaries
    try:
        vmem_cap = pltpu.get_tpu_info().vmem_capacity_bytes
    except Exception:
        vmem_cap = 64 << 20                         # conservative (v7x per-TC)
    ceiling = min(int(vmem_cap * 3 // 4), 96 << 20)
    vmem_limit = int(min(max(2 * est, 16 << 20), ceiling))

    kernel = functools.partial(_yolo_head_kernel, wh_rows)
    out_p = pl.pallas_call(
        kernel,
        out_shape=jax.ShapeDtypeStruct((B, CP, HW), out_dtype),
        grid=(B, n_hw),
        in_specs=[
            pl.BlockSpec((None, Cin, T), lambda b, j: (b, 0, j)),
            pl.BlockSpec((2, T), lambda b, j: (0, j)),
            pl.BlockSpec((CP, Cin), lambda b, j: (0, 0)),
            pl.BlockSpec((CWp, Cin), lambda b, j: (0, 0)),
            pl.BlockSpec((CP, 4), lambda b, j: (0, 0)),
            pl.BlockSpec((CWp, 2), lambda b, j: (0, 0)),
        ],
        out_specs=pl.BlockSpec((None, CP, T), lambda b, j: (b, 0, j)),
        compiler_params=pltpu.CompilerParams(
            dimension_semantics=("parallel", "parallel"),
            vmem_limit_bytes=vmem_limit),
    )(x_r, gxgy, w_all, w_wh, consts, consts_wh)

    # Single epilogue pass: drop row padding, split channels, move D last.
    # (slice fuses into the transpose; the reshape is a free contiguous split)
    out = out_p[:, :Cout, :].reshape(B, A, D, H, W).transpose(0, 1, 3, 4, 2)
    return out                                              # (B, A, H, W, D)


def yolo_head_ref(x_nchw, weight, bias, anchors, scale):
    """Pure-JAX reference matching PyTorch semantics (NCHW 1x1 conv + decode)."""
    B, Cin, H, W = x_nchw.shape
    Cout = weight.shape[0]
    A = anchors.shape[0]
    D = Cout // A
    y = jnp.einsum('bchw,oc->bohw', x_nchw, weight.reshape(Cout, Cin),
                   precision=jax.lax.Precision.HIGHEST)
    y = y + bias[None, :, None, None]
    y = y.reshape(B, A, D, H, W).transpose(0, 1, 3, 4, 2)     # (B, A, H, W, D)
    gx = jnp.arange(W, dtype=jnp.float32)[None, None, None, :]
    gy = jnp.arange(H, dtype=jnp.float32)[None, None, :, None]
    bx = (jax.nn.sigmoid(y[..., 0]) + gx) * scale
    by = (jax.nn.sigmoid(y[..., 1]) + gy) * scale
    bw = jnp.exp(y[..., 2]) * anchors[None, :, None, None, 0]
    bh = jnp.exp(y[..., 3]) * anchors[None, :, None, None, 1]
    rest = jax.nn.sigmoid(y[..., 4:])
    return jnp.concatenate(
        [bx[..., None], by[..., None], bw[..., None], bh[..., None], rest],
        axis=-1)


if __name__ == "__main__":
    key = jax.random.PRNGKey(0)
    anchors = jnp.array([[10.0, 13.0], [16.0, 30.0], [33.0, 23.0]],
                        dtype=jnp.float32)
    num_anchors, num_classes = 3, 3
    D = 5 + num_classes
    Cout = num_anchors * D

    def run_case(case_key, B, Cin, H, W, scale, hw_tile, bias_scale):
        k1, k2, k3 = jax.random.split(case_key, 3)
        x = jax.random.normal(k1, (B, Cin, H, W), dtype=jnp.float32)
        # Module init: weight ~ N(0, 0.01), bias = 0 (small nonzero bias in one
        # case to exercise the fused-bias path).
        weight = 0.01 * jax.random.normal(k2, (Cout, Cin, 1, 1),
                                          dtype=jnp.float32)
        bias = bias_scale * jax.random.normal(k3, (Cout,), dtype=jnp.float32)
        out = yolo_head_forward(x, weight, bias, anchors, scale,
                                hw_tile=hw_tile)
        out = jax.block_until_ready(out)
        ref = yolo_head_ref(x, weight, bias, anchors, scale)
        assert out.shape == (B, num_anchors, H, W, D), out.shape
        max_err = float(jnp.max(jnp.abs(out - ref)))
        assert jnp.allclose(out, ref, rtol=2e-2, atol=2e-2), max_err

    k1, k2 = jax.random.split(key)
    # Case 1: multiple lane-dense HW tiles (grid = (2, 2)).
    run_case(k1, B=2, Cin=32, H=16, W=16, scale=16.0, hw_tile=128,
             bias_scale=0.0)
    # Case 2: real-YOLO-style non-multiple-of-128 map (13x13 -> masked edge
    # tile), nonzero bias.
    run_case(k2, B=2, Cin=16, H=13, W=13, scale=32.0, hw_tile=128,
             bias_scale=0.05)
    print("KERNEL_OK")
</pallas_src>

<mosaic_0001>
module attributes {stable_mosaic.version = 11 : i64} {
  func.func @_yolo_head_kernel(%arg0: i32, %arg1: i32, %arg2: memref<1x32x128xf32, #tpu.memory_space<vmem>>, %arg3: memref<2x128xf32, #tpu.memory_space<vmem>>, %arg4: memref<24x32xbf16, #tpu.memory_space<vmem>>, %arg5: memref<8x32xf32, #tpu.memory_space<vmem>>, %arg6: memref<24x4xf32, #tpu.memory_space<vmem>>, %arg7: memref<8x2xf32, #tpu.memory_space<vmem>>, %arg8: memref<1x24x128xf32, #tpu.memory_space<vmem>>) attributes {dimension_semantics = [#tpu.dimension_semantics<parallel>, #tpu.dimension_semantics<parallel>], iteration_bounds = array<i64: 2, 2>, scalar_prefetch = 0 : i64, scratch_operands = 0 : i64, tpu.core_type = #tpu.core_type<tc>, window_params = [{transform_indices = @transform_0, window_bounds = array<i64: 1, 32, 128>}, {transform_indices = @transform_1, window_bounds = array<i64: 2, 128>}, {pipeline_mode = #tpu.pipeline_mode<synchronous>, transform_indices = @transform_2, window_bounds = array<i64: 24, 32>}, {pipeline_mode = #tpu.pipeline_mode<synchronous>, transform_indices = @transform_3, window_bounds = array<i64: 8, 32>}, {pipeline_mode = #tpu.pipeline_mode<synchronous>, transform_indices = @transform_4, window_bounds = array<i64: 24, 4>}, {pipeline_mode = #tpu.pipeline_mode<synchronous>, transform_indices = @transform_5, window_bounds = array<i64: 8, 2>}, {transform_indices = @transform_6, window_bounds = array<i64: 1, 24, 128>}]} {
    %c0 = arith.constant 0 : index
    %c0_0 = arith.constant 0 : index
    %c0_1 = arith.constant 0 : index
    %0 = vector.load %arg2[%c0, %c0_0, %c0_1] : memref<1x32x128xf32, #tpu.memory_space<vmem>>, vector<1x32x128xf32>
    %1 = vector.shape_cast %0 : vector<1x32x128xf32> to vector<32x128xf32>
    %c0_2 = arith.constant 0 : index
    %c0_3 = arith.constant 0 : index
    %2 = vector.load %arg3[%c0_2, %c0_3] : memref<2x128xf32, #tpu.memory_space<vmem>>, vector<1x128xf32>
    %c1 = arith.constant 1 : index
    %c0_4 = arith.constant 0 : index
    %3 = vector.load %arg3[%c1, %c0_4] : memref<2x128xf32, #tpu.memory_space<vmem>>, vector<1x128xf32>
    %c0_5 = arith.constant 0 : index
    %c0_6 = arith.constant 0 : index
    %4 = vector.load %arg4[%c0_5, %c0_6] : memref<24x32xbf16, #tpu.memory_space<vmem>>, vector<24x32xbf16>
    %5 = arith.truncf %1 : vector<32x128xf32> to vector<32x128xbf16>
    %cst = arith.constant dense<0.000000e+00> : vector<24x128xf32>
    %6 = tpu.matmul %4, %5, %cst {dimension_numbers = #tpu.dot_dimension_numbers<[1], [0], [0], [1], [0, 0, 1, 1], [], []>} : vector<24x32xbf16>, vector<32x128xbf16>, vector<24x128xf32> -> vector<24x128xf32>
    %c0_7 = arith.constant 0 : index
    %c0_8 = arith.constant 0 : index
    %7 = vector.load %arg6[%c0_7, %c0_8] : memref<24x4xf32, #tpu.memory_space<vmem>>, vector<24x4xf32>
    %8 = vector.extract_strided_slice %7 {offsets = [0, 0], sizes = [24, 1], strides = [1, 1]} : vector<24x4xf32> to vector<24x1xf32>
    %9 = vector.broadcast %8 : vector<24x1xf32> to vector<24x128xf32>
    %10 = arith.addf %6, %9 : vector<24x128xf32>
    %11 = arith.negf %10 : vector<24x128xf32>
    %12 = math.exp %11 : vector<24x128xf32>
    %cst_9 = arith.constant 1.000000e+00 : f32
    %13 = vector.broadcast %cst_9 : f32 to vector<24x128xf32>
    %14 = arith.addf %13, %12 : vector<24x128xf32>
    %15 = arith.divf %13, %14 : vector<24x128xf32>
    %16 = vector.extract_strided_slice %7 {offsets = [0, 1], sizes = [24, 1], strides = [1, 1]} : vector<24x4xf32> to vector<24x1xf32>
    %17 = vector.broadcast %16 : vector<24x1xf32> to vector<24x128xf32>
    %18 = arith.mulf %15, %17 : vector<24x128xf32>
    %19 = vector.extract_strided_slice %7 {offsets = [0, 2], sizes = [24, 1], strides = [1, 1]} : vector<24x4xf32> to vector<24x1xf32>
    %20 = vector.broadcast %2 : vector<1x128xf32> to vector<24x128xf32>
    %21 = vector.broadcast %19 : vector<24x1xf32> to vector<24x128xf32>
    %22 = arith.mulf %20, %21 : vector<24x128xf32>
    %23 = arith.addf %18, %22 : vector<24x128xf32>
    %24 = vector.extract_strided_slice %7 {offsets = [0, 3], sizes = [24, 1], strides = [1, 1]} : vector<24x4xf32> to vector<24x1xf32>
    %25 = vector.broadcast %3 : vector<1x128xf32> to vector<24x128xf32>
    %26 = vector.broadcast %24 : vector<24x1xf32> to vector<24x128xf32>
    %27 = arith.mulf %25, %26 : vector<24x128xf32>
    %28 = arith.addf %23, %27 : vector<24x128xf32>
    %c0_10 = arith.constant 0 : index
    %c0_11 = arith.constant 0 : index
    %c0_12 = arith.constant 0 : index
    %29 = vector.load %arg8[%c0_10, %c0_11, %c0_12] : memref<1x24x128xf32, #tpu.memory_space<vmem>>, vector<1x24x128xf32>
    %30 = vector.shape_cast %29 : vector<1x24x128xf32> to vector<24x128xf32>
    %31 = vector.shape_cast %28 : vector<24x128xf32> to vector<1x24x128xf32>
    tpu.vector_store %arg8[%c0_10, %c0_11, %c0_12], %31 {strides = array<i32>} : memref<1x24x128xf32, #tpu.memory_space<vmem>>, vector<1x24x128xf32>,
    %c0_13 = arith.constant 0 : index
    %c0_14 = arith.constant 0 : index
    %32 = vector.load %arg7[%c0_13, %c0_14] : memref<8x2xf32, #tpu.memory_space<vmem>>, vector<8x2xf32>
    %c0_15 = arith.constant 0 : index
    %c0_16 = arith.constant 0 : index
    %33 = vector.load %arg5[%c0_15, %c0_16] : memref<8x32xf32, #tpu.memory_space<vmem>>, vector<8x32xf32>
    %cst_17 = arith.constant dense<0.000000e+00> : vector<8x128xf32>
    %34 = tpu.matmul %33, %1, %cst_17 {dimension_numbers = #tpu.dot_dimension_numbers<[1], [0], [0], [1], [0, 0, 1, 1], [], []>} : vector<8x32xf32>, vector<32x128xf32>, vector<8x128xf32> -> vector<8x128xf32>
    %35 = vector.extract_strided_slice %32 {offsets = [0, 0], sizes = [8, 1], strides = [1, 1]} : vector<8x2xf32> to vector<8x1xf32>
    %36 = vector.broadcast %35 : vector<8x1xf32> to vector<8x128xf32>
    %37 = arith.addf %34, %36 : vector<8x128xf32>
    %38 = math.exp %37 : vector<8x128xf32>
    %39 = vector.extract_strided_slice %32 {offsets = [0, 1], sizes = [8, 1], strides = [1, 1]} : vector<8x2xf32> to vector<8x1xf32>
    %40 = vector.broadcast %39 : vector<8x1xf32> to vector<8x128xf32>
    %41 = arith.mulf %38, %40 : vector<8x128xf32>
    %42 = vector.extract_strided_slice %41 {offsets = [0, 0], sizes = [1, 128], strides = [1, 1]} : vector<8x128xf32> to vector<1x128xf32>
    %c0_18 = arith.constant 0 : index
    %c2 = arith.constant 2 : index
    %c0_19 = arith.constant 0 : index
    %43 = vector.load %arg8[%c0_18, %c2, %c0_19] : memref<1x24x128xf32, #tpu.memory_space<vmem>>, vector<1x1x128xf32>
    %44 = vector.shape_cast %43 : vector<1x1x128xf32> to vector<1x128xf32>
    %45 = vector.shape_cast %42 : vector<1x128xf32> to vector<1x1x128xf32>
    tpu.vector_store %arg8[%c0_18, %c2, %c0_19], %45 {strides = array<i32>} : memref<1x24x128xf32, #tpu.memory_space<vmem>>, vector<1x1x128xf32>,
    %46 = vector.extract_strided_slice %41 {offsets = [1, 0], sizes = [1, 128], strides = [1, 1]} : vector<8x128xf32> to vector<1x128xf32>
    %c0_20 = arith.constant 0 : index
    %c3 = arith.constant 3 : index
    %c0_21 = arith.constant 0 : index
    %47 = vector.load %arg8[%c0_20, %c3, %c0_21] : memref<1x24x128xf32, #tpu.memory_space<vmem>>, vector<1x1x128xf32>
    %48 = vector.shape_cast %47 : vector<1x1x128xf32> to vector<1x128xf32>
    %49 = vector.shape_cast %46 : vector<1x128xf32> to vector<1x1x128xf32>
    tpu.vector_store %arg8[%c0_20, %c3, %c0_21], %49 {strides = array<i32>} : memref<1x24x128xf32, #tpu.memory_space<vmem>>, vector<1x1x128xf32>,
    %50 = vector.extract_strided_slice %41 {offsets = [2, 0], sizes = [1, 128], strides = [1, 1]} : vector<8x128xf32> to vector<1x128xf32>
    %c0_22 = arith.constant 0 : index
    %c10 = arith.constant 10 : index
    %c0_23 = arith.constant 0 : index
    %51 = vector.load %arg8[%c0_22, %c10, %c0_23] : memref<1x24x128xf32, #tpu.memory_space<vmem>>, vector<1x1x128xf32>
    %52 = vector.shape_cast %51 : vector<1x1x128xf32> to vector<1x128xf32>
    %53 = vector.shape_cast %50 : vector<1x128xf32> to vector<1x1x128xf32>
    tpu.vector_store %arg8[%c0_22, %c10, %c0_23], %53 {strides = array<i32>} : memref<1x24x128xf32, #tpu.memory_space<vmem>>, vector<1x1x128xf32>,
    %54 = vector.extract_strided_slice %41 {offsets = [3, 0], sizes = [1, 128], strides = [1, 1]} : vector<8x128xf32> to vector<1x128xf32>
    %c0_24 = arith.constant 0 : index
    %c11 = arith.constant 11 : index
    %c0_25 = arith.constant 0 : index
    %55 = vector.load %arg8[%c0_24, %c11, %c0_25] : memref<1x24x128xf32, #tpu.memory_space<vmem>>, vector<1x1x128xf32>
    %56 = vector.shape_cast %55 : vector<1x1x128xf32> to vector<1x128xf32>
    %57 = vector.shape_cast %54 : vector<1x128xf32> to vector<1x1x128xf32>
    tpu.vector_store %arg8[%c0_24, %c11, %c0_25], %57 {strides = array<i32>} : memref<1x24x128xf32, #tpu.memory_space<vmem>>, vector<1x1x128xf32>,
    %58 = vector.extract_strided_slice %41 {offsets = [4, 0], sizes = [1, 128], strides = [1, 1]} : vector<8x128xf32> to vector<1x128xf32>
    %c0_26 = arith.constant 0 : index
    %c18 = arith.constant 18 : index
    %c0_27 = arith.constant 0 : index
    %59 = vector.load %arg8[%c0_26, %c18, %c0_27] : memref<1x24x128xf32, #tpu.memory_space<vmem>>, vector<1x1x128xf32>
    %60 = vector.shape_cast %59 : vector<1x1x128xf32> to vector<1x128xf32>
    %61 = vector.shape_cast %58 : vector<1x128xf32> to vector<1x1x128xf32>
    tpu.vector_store %arg8[%c0_26, %c18, %c0_27], %61 {strides = array<i32>} : memref<1x24x128xf32, #tpu.memory_space<vmem>>, vector<1x1x128xf32>,
    %62 = vector.extract_strided_slice %41 {offsets = [5, 0], sizes = [1, 128], strides = [1, 1]} : vector<8x128xf32> to vector<1x128xf32>
    %c0_28 = arith.constant 0 : index
    %c19 = arith.constant 19 : index
    %c0_29 = arith.constant 0 : index
    %63 = vector.load %arg8[%c0_28, %c19, %c0_29] : memref<1x24x128xf32, #tpu.memory_space<vmem>>, vector<1x1x128xf32>
    %64 = vector.shape_cast %63 : vector<1x1x128xf32> to vector<1x128xf32>
    %65 = vector.shape_cast %62 : vector<1x128xf32> to vector<1x1x128xf32>
    tpu.vector_store %arg8[%c0_28, %c19, %c0_29], %65 {strides = array<i32>} : memref<1x24x128xf32, #tpu.memory_space<vmem>>, vector<1x1x128xf32>,
    return
  }
  func.func @transform_0(%arg0: i32, %arg1: i32) -> (i32, i32, i32) {
    %c0_i32 = arith.constant 0 : i32
    %c0_i32_0 = arith.constant 0 : i32
    return %arg0, %c0_i32, %arg1 : i32, i32, i32
  }
  func.func @transform_1(%arg0: i32, %arg1: i32) -> (i32, i32) {
    %c0_i32 = arith.constant 0 : i32
    %c0_i32_0 = arith.constant 0 : i32
    return %c0_i32, %arg1 : i32, i32
  }
  func.func @transform_2(%arg0: i32, %arg1: i32) -> (i32, i32) {
    %c0_i32 = arith.constant 0 : i32
    %c0_i32_0 = arith.constant 0 : i32
    %c0_i32_1 = arith.constant 0 : i32
    return %c0_i32, %c0_i32_0 : i32, i32
  }
  func.func @transform_3(%arg0: i32, %arg1: i32) -> (i32, i32) {
    %c0_i32 = arith.constant 0 : i32
    %c0_i32_0 = arith.constant 0 : i32
    %c0_i32_1 = arith.constant 0 : i32
    return %c0_i32, %c0_i32_0 : i32, i32
  }
  func.func @transform_4(%arg0: i32, %arg1: i32) -> (i32, i32) {
    %c0_i32 = arith.constant 0 : i32
    %c0_i32_0 = arith.constant 0 : i32
    %c0_i32_1 = arith.constant 0 : i32
    return %c0_i32, %c0_i32_0 : i32, i32
  }
  func.func @transform_5(%arg0: i32, %arg1: i32) -> (i32, i32) {
    %c0_i32 = arith.constant 0 : i32
    %c0_i32_0 = arith.constant 0 : i32
    %c0_i32_1 = arith.constant 0 : i32
    return %c0_i32, %c0_i32_0 : i32, i32
  }
  func.func @transform_6(%arg0: i32, %arg1: i32) -> (i32, i32, i32) {
    %c0_i32 = arith.constant 0 : i32
    %c0_i32_0 = arith.constant 0 : i32
    return %arg0, %c0_i32, %arg1 : i32, i32, i32
  }
}

</mosaic_0001>

<bundles_post_ra>
// kernel: tpu_custom_call.1
= control target key start
LH: loop header
LB: loop body
LE: loop exit
PB: predicated region body
PF: predicated region fallthrough
CT: control target
= control target key end

     0   :  { %s1265_s0 = inlined_call_operand.hbm [shape: f32[2,32,256], index: 0, kind: input, shape index: {}]   ;;  %s1266_s1 = inlined_call_operand.vmem [shape: f32[2,256], index: 1, kind: input, shape index: {}]   ;;  %s1267_s2 = inlined_call_operand.vmem [shape: bf16[24,32], index: 2, kind: input, shape index: {}]   ;;  %s1268_s3 = inlined_call_operand.vmem [shape: f32[8,32], index: 3, kind: input, shape index: {}]   ;;  %s1269_s4 = inlined_call_operand.vmem [shape: f32[24,4], index: 4, kind: input, shape index: {}]   ;;  %s1270_s5 = inlined_call_operand.vmem [shape: f32[8,2], index: 5, kind: input, shape index: {}]   ;;  %s1271_s6 = inlined_call_operand.hbm [shape: f32[2,24,256], index: 6, kind: output, shape index: {}]  }
   0x1   :  { %1277 = sst [smem:[#allocation11_spill]] %s1271_s6 }
   0x2   :  { %11 = vsyncpa [#allocation3], 0 }
   0x3   :  { %13 = vsyncpa [#allocation3 + $0x1], 0 }
   0x4   :  { %14 = vsyncpa [#allocation4], 0 }
   0x5   :  { %16 = vsyncpa [#allocation4 + $0x1], 0  ;;  %s1040_s21 = smov 0   ;;  %s1042_s22 = smov 0  }
   0x6   :  { %s1044_s23 = smov 0   ;;  %s1046_s24 = smov 0  }
   0x7   :  { %s1048_s25 = smov 0   ;;  %s1050_s26 = smov 0  }
   0x8   :  { %s1052_s27 = smov 0   ;;  %s1054_s28 = smov 0  }
   0x9 LB: > { %1278 = sst [smem:[#allocation8_spill]] %s960_s21  ;;  %s685_s29 = sadd.s32 4294967295, %s988_s28   ;;  %s988_s28 = sphi %s1054_s28, %s22_s28   ;;  %s984_s27 = sphi %s1052_s27, %s1298_s27   ;;  %s980_s26 = sphi %s1050_s26, %s1297_s26   ;;  %s976_s25 = sphi %s1048_s25, %s1296_s25   ;;  %s972_s24 = sphi %s1046_s24, %s1295_s24   ;;  %s968_s23 = sphi %s1044_s23, %s1294_s23   ;;  %s964_s22 = sphi %s1042_s22, %s1293_s22   ;;  %s960_s21 = sphi %s1040_s21, %s1292_s21  }
   0xa   : > { %s686_s30 = sadd.s32 4294967294, %s988_s28   ;;  %s31_s7 = sadd.s32 1, %s980_s26 }
   0xb   : > { %s34_s8 = sadd.s32 1, %s984_s27  ;;  %p32_p0 = scmp.ge.s32.totalorder %s31_s7, 2 }
   0xc   : > { %s43_s9 = sadd.s32 1, %s968_s23  ;;  %p50_p1 = scmp.ne.s32.totalorder %s968_s23, %s964_s22 }
   0xd   : > { %p51_p2 = scmp.eq.s32.totalorder %s988_s28, 0  ;;  %s1300_s7 = smov (%p32_p0, %s31_s7), 0 }
   0xe   : > { %1279 = sst [smem:[#allocation9_spill]] %s1300_s7  ;;  %s1302_s8 = smov (!%p32_p0, %s34_s8), %s984_s27 }
   0xf   : > { %s39_s10 = ssub.s32 %s980_s26, %s1300_s7  ;;  %p1093_p3 = por %p51_p2, %p50_p1 }
  0x10   : > { %p36_p4 = scmp.ge.s32.totalorder %s1302_s8, 2  ;;  %p56_p5 = scmp.ne.s32.totalorder %s964_s22, %s960_s21 }
  0x11   : > { %p57_p6 = scmp.eq.s32.totalorder %s685_s29, 0  ;;  %p192_p7 = scmp.eq.s32.totalorder %s685_s29, 3 }
  0x12   : > { %s1304_s8 = smov (%p36_p4, %s1302_s8), 0  ;;  %p198_p10 = scmp.eq.s32.totalorder %s686_s30, 3 }
  0x13   : > { %1281 = sst [smem:[#allocation10_spill]] %s1304_s8  ;;  %p1101_p8 = por %p57_p6, %p56_p5 }
  0x14   : > { %p1105_p9 = por %p192_p7, %p50_p1  ;;  %s38_s14 = ssub.s32 %s984_s27, %s1304_s8 }
  0x15   : > { %s40_s15 = sor.u32 %s39_s10, %s38_s14  ;;  %p1111_p12 = por %p198_p10, %p56_p5 }
  0x16   : > { %s1283_s13 = scalar_select %p1105_p9, 1, 0 }
  0x17   : > { %p41_p11 = scmp.eq.s32.totalorder %s40_s15, 0  ;;  %p756_p13 = scmp.lt.s32.totalorder %s988_s28, 4 }
  0x18   : > { %s1284_s16 = scalar_select %p1111_p12, 1, 0 }
  0x19   : > { %s230_s17 = sand.u32 1, %s968_s23   ;;  %s690_s20 = sshll.u32 %s984_s27, 3 }
  0x1a   : > { %s1118_s18 = scalar_select %p41_p11, %s968_s23, %s43_s9  }
  0x1b   : > { %s689_s19 = sshll.u32 %s230_s17, 5  ;;  %s239_s29 = sadd.s32 %s980_s26, %s690_s20 }
  0x1c   : > { %s234_s7 = scalar_lea.vmem [#allocation2], %s689_s19  ;;  %s691_s6 = sshll.u32 %s239_s29, 7 }
  0x1d   : > { %s242_s21 = sshll.u32 %s234_s7, 4  ;;  %s1127_s10 = scalar_lea.hbm %s1265_s0, %s691_s6  ;;  %s1122_s21 = int_to_ptr.vmem [resolvable:$true] %s242_s21 }
  0x1e   : > { %p1131_p0 = pnand %p756_p13, %p1093_p3  ;;  %s1135_s7 = scalar_lea.sflag [#allocation3], %s230_s17 }
  0x1f   : > { %s860_s14 = scalar_lea.hbm %s1127_s10, 512  ;;  %s865_s11 = scalar_lea.hbm %s1265_s0, 2048 }
  0x20   : > { %p861_p1 = scmp.ne.s32.totalorder %s1127_s10, %s860_s14  ;;  %p862_p2 = pneg %p1131_p0 }
  0x21   : > { %p866_p3 = scmp.lt.u32.totalorder %s1127_s10, %s1265_s0  ;;  %p867_p6 = scmp.lt.u32.totalorder %s865_s11, %s860_s14 }
  0x22   : > { %p863_p4 = pnand %p862_p2, %p861_p1  ;;  %p869_p10 = scmp.lt.u32.totalorder %s860_s14, %s1127_s10 }
  0x23   : > { %p868_p7 = por %p867_p6, %p866_p3 }
  0x24   : > { %p864_p5 = pneg %p863_p4 }
  0x25   : > { %p870_p11 = por %p869_p10, %p868_p7 }
  0x27   : > { %p871_p13 = pnand %p870_p11, %p864_p5 }
  0x29   : > { %874 = shalt.err (!%p871_p13)
}
  0x2a   : > { %s875_s17 = scalar_lea.vmem %s1122_s21, 512  ;;  %s990_s20 = smov [#allocation2]  }
  0x2b   : > { %p876_p1 = scmp.ne.s32.totalorder %s1122_s21, %s875_s17  ;;  %s880_s29 = sshll.u32 %s990_s20, 4  ;;  %s881_s29 = int_to_ptr.vmem [resolvable:$false] %s880_s29 }
  0x2c   : > { %s882_s30 = scalar_lea.vmem %s881_s29, 1024  ;;  %p883_p9 = scmp.lt.s32.totalorder %s1122_s21, %s881_s29 }
  0x2d   : > { %p878_p4 = pnand %p876_p1, %p862_p2  ;;  %p884_p3 = scmp.lt.s32.totalorder %s882_s30, %s875_s17 }
  0x2f   : > { %p879_p12 = pneg %p878_p4  ;;  %p885_p6 = por %p884_p3, %p883_p9 }
  0x31   : > { %p886_p7 = pnand %p885_p6, %p879_p12 }
  0x33   : > { %889 = shalt.err (!%p886_p7)
}
  0x34   : > { %s991_s14 = smov 256   ;;  %s992_s6 = smov 128  }
  0x35   : > { %s993_s8 = smov 8   ;;  %p692_p2 = scmp.ge.s32.totalorder %s988_s28, 1 }
  0x36   : > { %751 = dma.hbm_to_vmem [thread:$0]  (!%p1131_p0), %s1127_s10, 512, %s1122_s21, %s1135_s7, %s991_s14, %s992_s6, %s993_s8  }
  0x37   : > { %p257_p5 = scmp.lt.s32.totalorder %s988_s28, 5 }
  0x39   : > { %p258_p10 = pnand %p692_p2, %p257_p5 }
  0x3a   : > { %s1166_s11 = sand.u32 (!%p258_p10), 1, %s964_s22  }
  0x3b   : > { %261 = sbr.rel (%p258_p10) target bundleno = 345 (0x159), region = 44  ;;  %s693_s15 = sshll.u32 (!%p258_p10), %s1166_s11, 5 }
  0x3c   : > { %s264_s19 = scalar_lea.sflag (!%p258_p10), [#allocation3], %s1166_s11  ;;  %s267_s17 = scalar_lea.vmem (!%p258_p10), [#allocation2], %s693_s15 }
  0x42   : > { %951 = dma.done.wait (%p1101_p8), %s264_s19, 512  }
  0x43   : > { %953 = vsyncadd (%p1101_p8), %s264_s19, 4294966784  ;;  %v994_v0 = vmov 0.0|0.0   ;;  %vm995_vm0 = vmmov 0   ;;  %v996_v1 = vmov 0.0   ;;  %v997_v2 = vmov 0   ;;  %v305_v3 = vld [vmem:[%s267_s17] sm:$0xff] }
  0x44   : > { %736 = vmatprep.subr.bf16.mxu1 %v994_v0  ;;  %733 = vmatprep.mubr.msk.f32.mxu1 %vm995_vm0, %v996_v1  ;;  %v306_v4 = vld [vmem:[%s267_s17 + $0x8] sm:$0xff]  ;;  %v307_v5 = vld [vmem:[%s267_s17 + $0x10] sm:$0xff]  ;;  %v308_v7 = vld [vmem:[%s267_s17 + $0x18] sm:$0xff]  ;;  %vm342_vm1 = vcmask 261120   ;;  %v998_v16 = vmov 1   ;;  %v999_v17 = vmov 2  }
  0x45   : > { %835 = vset.pattern.permute.xlu0 %v997_v2  ;;  %836 = vset.pattern.permute.xlu1 %v997_v2  ;;  %v314_v6 = vpack.c.bf16 %v306_v4, %v305_v3  ;;  %v315_v8 = vpack.c.bf16 %v308_v7, %v307_v5  ;;  %v844_v9 = vld [vmem:[%s1267_s2] sm:$0xff]   ;;  %v318_v11 = vld [vmem:[%s1269_s4 + $0x10] sm:$0xff]  ;;  %v845_v12 = vld [vmem:[%s1267_s2 + $0x8] ss:$0 sps:$4 sm:$0xff]   ;;  %v1000_v18 = vmov 3   ;;  %p300_p8 = scmp.lt.s32.totalorder %s972_s24, 1 }
  0x46   : > { %v316_v10 = vld [vmem:[%s1269_s4] sm:$0xff]  ;;  %721 = vmatprep.mubr.msk.bf16.mxu0 %vm342_vm1, %v844_v9  ;;  %331 = vperm.xlu1 %836, %v318_v11   ;;  %v317_v14 = vld [vmem:[%s1269_s4 + $0x8] sm:$0xff]  ;;  %s743_s20 = smul.u32 6, %s976_s25  ;;  %s1286_s15 = sld [smem:[#allocation11_spill]] }
  0x47   : > { %717 = vmatprep.subr.bf16.mxu0 %v314_v6  ;;  %738 = vmatpush3.bf16.msra.mxu1 %v314_v6  ;;  %v478_v13 = vld [vmem:[%s1268_s3] sm:$0xff]  ;;  %s301_s21 = scalar_select %p300_p8, %s972_s24, 1 }
  0x48   : > { %718 = vmatpush3.bf16.msra.mxu0 %v314_v6  ;;  %739 = vmatprep.subr.bf16.mxu1 %v994_v0  ;;  %v477_v15 = vld [vmem:[%s1270_s5] sm:$0xff]  ;;  %s742_s29 = smul.u32 24, %s1166_s11  ;;  %s582_s30 = sadd.s32 %s972_s24, %s743_s20 }
  0x49   : > { %719 = vmatprep.subr.bf16.mxu0 %v315_v8  ;;  %321 = vperm.xlu0 %835, %v316_v10   ;;  %s694_s10 = sshll.u32 %s301_s21, 1  ;;  %s705_s25 = sshll.u32 %s582_s30, 7 }
  0x4a   : > { %481 = vperm.xlu1 %836, %v477_v15   ;;  %s303_s7 = scalar_lea.vmem %s1266_s1, %s694_s10  ;;  %s299_s14 = scalar_lea.vmem [#allocation5], %s742_s29 }
  0x4b   : > { %741 = vmatpush3.bf16.msra.mxu1 %v315_v8  ;;  %v702_v51 = vld [vmem:[%s303_s7] ss:$0 sm:$0xff]  ;;  %v703_v52 = vld [vmem:[%s303_s7 + $0x1] ss:$0 sm:$0xff]  ;;  %s585_s6 = sshll.u32 %s299_s14, 4  ;;  %s571_s17 = scalar_lea.sflag [#allocation4], %s1166_s11  ;;  %s1206_s6 = int_to_ptr.vmem [resolvable:$true] %s585_s6 }
  0x4c   : > { %720 = vmatpush3.bf16.msra.mxu0 %v315_v8  ;;  %s1211_s19 = scalar_lea.hbm %s1286_s15, %s705_s25  ;;  %s890_s21 = scalar_lea.vmem %s1206_s6, 384 }
  0x4d   : > { %326 = vperm.xlu0 %835, %v317_v14   ;;  %p891_p9 = scmp.ne.s32.totalorder %s1206_s6, %s890_s21  ;;  %p1287_p12 = scmp.ne.s32.totalorder %s1283_s13, 0 }
  0x4e   : > { %734 = vmatmul.mubr.msk.f32.vlgmr.msra.gmra.mrb[0].mxu1 %vm342_vm1, %v478_v13  ;;  %838 = vset.pattern.permute.xlu1 %v998_v16  ;;  %s1001_s10 = smov [#allocation5]  }
  0x4f   : > { %722 = vmatmul.mubr.msk.bf16.vlgmr.msra.gmra.mrb[0].mxu0 %vm342_vm1, %v845_v12  ;;  %420 = vperm.xlu1 %838, %v317_v14   ;;  %p892_p0 = pnand %p891_p9, %p1287_p12  ;;  %s894_s12 = sshll.u32 %s1001_s10, 4  ;;  %s895_s12 = int_to_ptr.vmem [resolvable:$false] %s894_s12 }
  0x50   : > { %s896_s9 = scalar_lea.vmem %s895_s12, 768  ;;  %p897_p13 = scmp.lt.s32.totalorder %s1206_s6, %s895_s12 }
  0x51   : > { %837 = vset.pattern.permute.xlu0 %v998_v16  ;;  %p893_p11 = pneg %p892_p0  ;;  %p898_p1 = scmp.lt.s32.totalorder %s896_s9, %s890_s21 }
  0x52   : > { %416 = vperm.xlu0 %837, %v316_v10  }
  0x53   : > { %424 = vperm.xlu1 %838, %v318_v11   ;;  %p899_p4 = por %p898_p1, %p897_p13 }
  0x55   : > { %p900_p3 = pnand %p899_p4, %p893_p11 }
  0x56   : > { %839 = vset.pattern.permute.xlu0 %v999_v17 }
  0x57   : > { %435 = vperm.xlu0 %839, %v316_v10   ;;  %840 = vset.pattern.permute.xlu1 %v999_v17 }
  0x58   : > { %439 = vperm.xlu1 %840, %v317_v14  }
  0x5b   : > { %841 = vset.pattern.permute.xlu0 %v1000_v18 }
  0x5c   : > { %457 = vperm.xlu0 %841, %v316_v10   ;;  %443 = vperm.xlu1 %840, %v318_v11  }
  0x60   : > { %843 = vset.pattern.permute.xlu0 %v998_v16  ;;  %842 = vset.pattern.permute.xlu1 %v1000_v18 }
  0x61   : > { %560 = vperm.xlu0 %843, %v477_v15   ;;  %461 = vperm.xlu1 %842, %v317_v14  }
  0x65   : > { %465 = vperm.xlu1 %842, %v318_v11  }
  0xc5   : > { %v332_v19 = vpop.permute.xlu1 %331 }
  0xc8   : > { %v322_v22 = vpop.permute.xlu0 %321 }
  0xc9   : > { %v482_v20 = vpop.permute.xlu1 %481 }
  0xcc   : > { %v327_v31 = vpop.permute.xlu0 %326 }
  0xce   : > { %v421_v21 = vpop.permute.xlu1 %420 }
  0xd1   : > { %v417_v39 = vpop.permute.xlu0 %416 }
  0xd2   : > { %v425_v30 = vpop.permute.xlu1 %424 }
  0xd6   : > { %v436_v48 = vpop.permute.xlu0 %435 }
  0xd7   : > { %v440_v37 = vpop.permute.xlu1 %439  ;;  %v446_v61 = vmul.f32 %v702_v51, %v436_v48 }
  0xd8   : > { %v447_v4 = vmul.f32 %v702_v51, %v440_v37 }
  0xdb   : > { %v444_v40 = vpop.permute.xlu1 %443  ;;  %v458_v50 = vpop.permute.xlu0 %457 }
  0xdc   : > { %v448_v57 = vmul.f32 %v702_v51, %v444_v40  ;;  %v468_v62 = vmul.f32 %v703_v52, %v458_v50 }
  0xe0   : > { %v462_v49 = vpop.permute.xlu1 %461  ;;  %v561_v0 = vpop.permute.xlu0 %560 }
  0xe1   : > { %v469_v9 = vmul.f32 %v703_v52, %v462_v49 }
  0xe4   : > { %v466_v53 = vpop.permute.xlu1 %465 }
  0xe5   : > { %v470_v58 = vmul.f32 %v703_v52, %v466_v53 }
 0x121   : > { %v553_v23 = vpop.f32.mrb[0].mxu1 }
 0x122   : > { %v723_v24 = vpop.f32.mrb[0].mxu0  ;;  %v735_v25 = vpop.f32.mrb[1].mxu1  ;;  %v554_v38 = vadd.f32 %v553_v23, %v482_v20 }
 0x123   : > { %v392_v26 = vadd.f32 %v723_v24, %v332_v19  ;;  %v383_v27 = vpop.f32.mrb[1].mxu0 }
 0x124   : > { %v384_v28 = vadd.f32 %v383_v27, %v322_v22  ;;  %v724_v29 = vpop.f32.mrb[2].mxu0  ;;  %v557_v44 = vmul.f32 1.442695, %v554_v38 }
 0x125   : > { %v701_v32 = vmul.f32 -1.442695, %v392_v26  ;;  %v386_v33 = vpop.f32.mrb[3].mxu0 }
 0x126   : > { %v699_v34 = vmul.f32 -1.442695, %v384_v28  ;;  %v387_v35 = vadd.f32 %v386_v33, %v327_v31 }
 0x127   : > { %846 = vpow2.f32 %v701_v32 }
 0x128   : > { %848 = vpow2.f32 %v699_v34  ;;  %v700_v36 = vmul.f32 -1.442695, %v387_v35 }
 0x12a   : > { %850 = vpow2.f32 %v700_v36 }
 0x131   : > { %v847_v41 = vpop.eup %846 }
 0x132   : > { %v849_v42 = vpop.eup %848  ;;  %v408_v43 = vadd.f32 1.0, %v847_v41 }
 0x133   : > { %v406_v45 = vadd.f32 1.0, %v849_v42 }
 0x134   : > { %v851_v46 = vpop.eup %850  ;;  %852 = vrcp.f32 %v408_v43 }
 0x135   : > { %854 = vrcp.f32 %v406_v45  ;;  %v407_v47 = vadd.f32 1.0, %v851_v46 }
 0x136   : > { %856 = vpow2.f32 %v557_v44 }
 0x137   : > { %858 = vrcp.f32 %v407_v47 }
 0x13e   : > { %v853_v54 = vpop.eup %852 }
 0x13f   : > { %v855_v55 = vpop.eup %854  ;;  %v429_v56 = vmul.f32 %v853_v54, %v425_v30 }
 0x140   : > { %v857_v59 = vpop.eup %856  ;;  %v427_v60 = vmul.f32 %v855_v55, %v417_v39 }
 0x141   : > { %v859_v63 = vpop.eup %858  ;;  %v451_v1 = vadd.f32 %v448_v57, %v429_v56  ;;  %v563_v8 = vmul.f32 %v857_v59, %v561_v0 }
 0x142   : > { %v428_v2 = vmul.f32 %v859_v63, %v421_v21  ;;  %v449_v3 = vadd.f32 %v446_v61, %v427_v60 }
 0x143   : > { %v473_v5 = vadd.f32 %v470_v58, %v451_v1 }
 0x144   : > { %v471_v6 = vadd.f32 %v468_v62, %v449_v3  ;;  %v450_v7 = vadd.f32 %v447_v4, %v428_v2 }
 0x145   : > { %476 = vst [vmem:[%s299_s14 + $0x10] sm:$0xff] %v473_v5 }
 0x146   : > { %474 = vst [vmem:[%s299_s14] sm:$0xff] %v471_v6  ;;  %v472_v10 = vadd.f32 %v469_v9, %v450_v7  ;;  %568 = vst [vmem:[%s299_s14 + $0xe] sm:$0x30] %v563_v8  }
 0x147   : > { %564 = vst [vmem:[%s299_s14 + $0x2] sm:$0x3] %v563_v8  }
 0x148   : > { %475 = vst [vmem:[%s299_s14 + $0x8] sm:$0xff] %v472_v10 }
 0x149   : > { %566 = vst [vmem:[%s299_s14 + $0x8] sm:$0xc] %v563_v8  }
 0x14a   : > { %903 = shalt.err (!%p900_p3)
}
 0x14b   : > { %s904_s7 = scalar_lea.hbm %s1211_s19, 384  ;;  %s908_s30 = scalar_lea.hbm %s1286_s15, 1536 }
 0x14c   : > { %p905_p6 = scmp.ne.s32.totalorder %s1211_s19, %s904_s7  ;;  %p909_p5 = scmp.lt.u32.totalorder %s1211_s19, %s1286_s15 }
 0x14d   : > { %p910_p10 = scmp.lt.u32.totalorder %s908_s30, %s904_s7  ;;  %p912_p9 = scmp.lt.u32.totalorder %s904_s7, %s1211_s19 }
 0x14e   : > { %p906_p7 = pnand %p905_p6, %p1287_p12 }
 0x14f   : > { %p911_p8 = por %p910_p10, %p909_p5 }
 0x150   : > { %p907_p2 = pneg %p906_p7 }
 0x151   : > { %p913_p0 = por %p912_p9, %p911_p8 }
 0x153   : > { %p914_p11 = pnand %p913_p0, %p907_p2 }
 0x155   : > { %917 = shalt.err (!%p914_p11)
}
 0x156   : > { %s1002_s24 = smov 128   ;;  %s1003_s8 = smov 256  }
 0x157   : > { %s1004_s21 = smov 8  }
 0x158   : > { %746 = dma.vmem_to_hbm [thread:$0]  (%p1287_p12), %s1206_s6, 384, %s1211_s19, %s571_s17, %s1002_s24, %s1003_s8, %s1004_s21  }
 0x159 PF: > { %s1288_s10 = sld [smem:[#allocation8_spill]]  ;;  %p757_p13 = scmp.ge.s32.totalorder %s988_s28, 2 }
 0x15a   : > { %p1289_p1 = scmp.ne.s32.totalorder %s1284_s16, 0 }
 0x15c   : > { %p753_p4 = pnand %p757_p13, %p1289_p1 }
 0x15f   : > { %s600_s12 = sand.u32 1, %s1288_s10  }
 0x160   : > { %s601_s9 = scalar_lea.sflag [#allocation4], %s600_s12 }
 0x161   : > { %955 = dma.done.wait (!%p753_p4), %s601_s9, 384  }
 0x162   : > { %957 = vsyncadd (!%p753_p4), %s601_s9, 4294966912  ;;  %s22_s28 = sadd.s32 1, %s988_s28   ;;  %s1290_s13 = sld [smem:[#allocation9_spill]] }
 0x163   : > { %p19_p3 = scmp.ge.s32.totalorder %s22_s28, 6   ;;  %s1291_s11 = sld [smem:[#allocation10_spill]] }
 0x164   : > { %s1292_s21 = smov %s964_s22  ;;  %s1293_s22 = smov %s968_s23 }
 0x165   : > { %s1294_s23 = smov %s1118_s18  ;;  %s1295_s24 = smov %s980_s26 }
 0x166   : > { %s1296_s25 = smov %s984_s27  ;;  %21 = sbr.rel (!%p19_p3) target bundleno = 9 (0x9), region = 92 }
 0x168   : > { %s1297_s26 = smov %s1290_s13 }
 0x169   : > { %s1298_s27 = smov %s1291_s11 }
 0x16d   :  { %606 = vsyncpa [#allocation3], 1 }
 0x16e   :  { %608 = vsyncpa [#allocation3 + $0x1], 1 }
 0x16f   :  { %609 = vsyncpa [#allocation4], 1 }
 0x170   :  { %611 = vsyncpa [#allocation4 + $0x1], 1 }

</bundles_post_ra>
